<compile_context>
chip_gen: v6e
topology: v6e:2x2x1
jax: 0.10.0
libtpu: 0.0.40
codegen_flags: <defaults>
</compile_context>

<pallas_src>
import functools

import jax
import jax.numpy as jnp
from jax.experimental import pallas as pl
from jax.experimental.pallas import tpu as pltpu

_NEG_LARGE = -1e30  # finite "-inf" used to mask padded timesteps


def _attn_pool_kernel(x_ref, w_ref, o_ref, m_sc, l_sc, acc_sc, *,
                      seq_len, seq_tile, need_mask):
    j = pl.program_id(1)  # sequence-tile index (reduction axis, last in grid)

    @pl.when(j == 0)
    def _init():
        m_sc[...] = jnp.full_like(m_sc, -jnp.inf)
        l_sc[...] = jnp.zeros_like(l_sc)
        acc_sc[...] = jnp.zeros_like(acc_sc)

    x = x_ref[...].astype(jnp.float32)          # (G, Tt, H), cast in-register (f32 math on all chips)
    w = w_ref[...].astype(jnp.float32)          # (1, H)

    # scores = x . w   (bias dropped: softmax shift-invariance makes it a no-op)
    s = jnp.sum(x * w, axis=-1)                 # (G, Tt)  VPU mul + lane reduce (H small)

    if need_mask:
        col = jax.lax.broadcasted_iota(jnp.int32, s.shape, 1) + j * seq_tile
        s = jnp.where(col < seq_len, s, _NEG_LARGE)

    # Online softmax accumulation across sequence tiles.
    m_prev = m_sc[...]                                                  # (G, 1)
    m_new = jnp.maximum(m_prev, jnp.max(s, axis=-1, keepdims=True))     # (G, 1)
    alpha = jnp.exp(m_prev - m_new)                                     # (G, 1)
    p = jnp.exp(s - m_new)                                              # (G, Tt)

    l_sc[...] = alpha * l_sc[...] + jnp.sum(p, axis=-1, keepdims=True)
    acc_sc[...] = alpha * acc_sc[...] + jnp.sum(x * p[:, :, None], axis=1)
    m_sc[...] = m_new

    @pl.when(j == pl.num_programs(1) - 1)
    def _finalize():
        # Exact reciprocal, applied once to the (G, H) accumulator (T-fewer multiplies
        # than scaling the attention vector, full precision).
        inv = pl.reciprocal(l_sc[...], approx=False)
        o_ref[...] = (acc_sc[...] * inv).astype(o_ref.dtype)


def self_attention_pooling(x, weight, bias=None, *, rows_per_block=8, seq_block=512):
    """SelfAttentionPooling forward.

    x:      (B, T, H), any float dtype (bf16 recommended in HBM; cast to f32 in-kernel)
    weight: (1, H) or (H,)  -- torch nn.Linear(H, 1).weight layout
    bias:   accepted for API parity but unused (softmax shift invariance -> no-op)
    returns (B, H) in x.dtype
    """
    del bias
    B, T, H = x.shape
    w = jnp.asarray(weight).reshape(1, H)

    G = max(1, rows_per_block)
    B_pad = pl.cdiv(B, G) * G

    if T <= seq_block:
        seq_tile = T                              # whole sequence in one tile (full extent)
        T_pad = T
    else:
        seq_tile = max(8, (seq_block // 8) * 8)   # sublane-aligned sequence tile
        T_pad = pl.cdiv(T, seq_tile) * seq_tile
    need_mask = T_pad != T

    if B_pad != B or T_pad != T:
        x = jnp.pad(x, ((0, B_pad - B), (0, T_pad - T), (0, 0)))

    kernel = functools.partial(_attn_pool_kernel, seq_len=T, seq_tile=seq_tile,
                               need_mask=need_mask)

    out = pl.pallas_call(
        kernel,
        out_shape=jax.ShapeDtypeStruct((B_pad, H), x.dtype),
        grid_spec=pltpu.PrefetchScalarGridSpec(
            num_scalar_prefetch=0,
            grid=(B_pad // G, T_pad // seq_tile),
            in_specs=[
                pl.BlockSpec((G, seq_tile, H), lambda i, j: (i, j, 0)),  # per (row-group, seq-tile)
                pl.BlockSpec((1, H), lambda i, j: (0, 0)),               # shared weight
            ],
            out_specs=pl.BlockSpec((G, H), lambda i, j: (i, 0)),         # resident across seq axis
            scratch_shapes=[
                pltpu.VMEM((G, 1), jnp.float32),   # running max
                pltpu.VMEM((G, 1), jnp.float32),   # running denominator
                pltpu.VMEM((G, H), jnp.float32),   # running weighted sum
            ],
        ),
        compiler_params=pltpu.CompilerParams(
            dimension_semantics=("parallel", "arbitrary"),
        ),
    )(x, w)

    return out[:B]


def _reference(x, weight, bias):
    # Pure-JAX reference mirroring the PyTorch forward exactly (bias included).
    xf = x.astype(jnp.float32)
    scores = jnp.einsum("bth,h->bt", xf, weight.reshape(-1).astype(jnp.float32)) + bias[0]
    attn = jax.nn.softmax(scores, axis=-1)[..., None]
    return jnp.sum(xf * attn, axis=1).astype(x.dtype)


if __name__ == "__main__":
    key = jax.random.PRNGKey(0)
    k_x, k_w, k_b, k_x2 = jax.random.split(key, 4)

    B, T, H = 2, 8, 32
    x = jax.random.normal(k_x, (B, T, H), dtype=jnp.float32)
    bound = 1.0 / jnp.sqrt(H)
    weight = jax.random.uniform(k_w, (1, H), minval=-bound, maxval=bound, dtype=jnp.float32)
    bias = jax.random.uniform(k_b, (1,), minval=-bound, maxval=bound, dtype=jnp.float32)

    # 1) Small f32 case (module's default dtype).
    out = jax.block_until_ready(self_attention_pooling(x, weight, bias))
    ref = _reference(x, weight, bias)
    assert out.shape == (B, H)
    assert jnp.allclose(out, ref, atol=1e-4, rtol=1e-4), "f32 mismatch vs reference"

    # 2) Exercise batch padding + sequence tiling + online-softmax masking.
    B2, T2 = 3, 37
    x2 = jax.random.normal(k_x2, (B2, T2, H), dtype=jnp.float32)
    out2 = jax.block_until_ready(self_attention_pooling(x2, weight, bias, seq_block=16))
    ref2 = _reference(x2, weight, bias)
    assert out2.shape == (B2, H)
    assert jnp.allclose(out2, ref2, atol=1e-4, rtol=1e-4), "tiled/masked mismatch vs reference"

    # 3) bf16-in-HBM path (no host upcast; cast happens in-register inside the kernel).
    x_bf = x.astype(jnp.bfloat16)
    out_bf = jax.block_until_ready(self_attention_pooling(x_bf, weight, bias))
    ref_bf = _reference(x_bf, weight, bias)
    assert out_bf.dtype == jnp.bfloat16
    assert jnp.allclose(out_bf.astype(jnp.float32), ref_bf.astype(jnp.float32),
                        atol=3e-2, rtol=3e-2), "bf16 mismatch vs reference"

    print("KERNEL_OK")
</pallas_src>

<mosaic_0001>
module attributes {stable_mosaic.version = 11 : i64} {
  func.func @_attn_pool_kernel(%arg0: i32, %arg1: i32, %arg2: memref<8x8x32xf32, #tpu.memory_space<vmem>>, %arg3: memref<1x32xf32, #tpu.memory_space<vmem>>, %arg4: memref<8x32xf32, #tpu.memory_space<vmem>>, %arg5: memref<8x1xf32, #tpu.memory_space<vmem>>, %arg6: memref<8x1xf32, #tpu.memory_space<vmem>>, %arg7: memref<8x32xf32, #tpu.memory_space<vmem>>) attributes {dimension_semantics = [#tpu.dimension_semantics<parallel>, #tpu.dimension_semantics<arbitrary>], iteration_bounds = array<i64: 1, 1>, scalar_prefetch = 0 : i64, scratch_operands = 3 : i64, tpu.core_type = #tpu.core_type<tc>, window_params = [{transform_indices = @transform_0, window_bounds = array<i64: 8, 8, 32>}, {pipeline_mode = #tpu.pipeline_mode<synchronous>, transform_indices = @transform_1, window_bounds = array<i64: 1, 32>}, {transform_indices = @transform_2, window_bounds = array<i64: 8, 32>}]} {
    %c0_i32 = arith.constant 0 : i32
    %0 = arith.cmpi eq, %arg1, %c0_i32 : i32
    %1 = arith.extui %0 : i1 to i32
    %c0_i32_0 = arith.constant 0 : i32
    %2 = arith.cmpi ne, %1, %c0_i32_0 : i32
    scf.if %2 {
      %cst_22 = arith.constant 0xFF800000 : f32
      %37 = vector.broadcast %cst_22 : f32 to vector<8x1xf32>
      %c0_23 = arith.constant 0 : index
      %c0_24 = arith.constant 0 : index
      %38 = vector.load %arg5[%c0_23, %c0_24] : memref<8x1xf32, #tpu.memory_space<vmem>>, vector<8x1xf32>
      tpu.vector_store %arg5[%c0_23, %c0_24], %37 {strides = array<i32>} : memref<8x1xf32, #tpu.memory_space<vmem>>, vector<8x1xf32>,
      %cst_25 = arith.constant 0.000000e+00 : f32
      %39 = vector.broadcast %cst_25 : f32 to vector<8x1xf32>
      %c0_26 = arith.constant 0 : index
      %c0_27 = arith.constant 0 : index
      %40 = vector.load %arg6[%c0_26, %c0_27] : memref<8x1xf32, #tpu.memory_space<vmem>>, vector<8x1xf32>
      tpu.vector_store %arg6[%c0_26, %c0_27], %39 {strides = array<i32>} : memref<8x1xf32, #tpu.memory_space<vmem>>, vector<8x1xf32>,
      %cst_28 = arith.constant 0.000000e+00 : f32
      %41 = vector.broadcast %cst_28 : f32 to vector<8x32xf32>
      %c0_29 = arith.constant 0 : index
      %c0_30 = arith.constant 0 : index
      %42 = vector.load %arg7[%c0_29, %c0_30] : memref<8x32xf32, #tpu.memory_space<vmem>>, vector<8x32xf32>
      tpu.vector_store %arg7[%c0_29, %c0_30], %41 {strides = array<i32>} : memref<8x32xf32, #tpu.memory_space<vmem>>, vector<8x32xf32>,
    } else {
    }
    %c0 = arith.constant 0 : index
    %c0_1 = arith.constant 0 : index
    %c0_2 = arith.constant 0 : index
    %3 = vector.load %arg2[%c0, %c0_1, %c0_2] : memref<8x8x32xf32, #tpu.memory_space<vmem>>, vector<8x8x32xf32>
    %c0_3 = arith.constant 0 : index
    %c0_4 = arith.constant 0 : index
    %4 = vector.load %arg3[%c0_3, %c0_4] : memref<1x32xf32, #tpu.memory_space<vmem>>, vector<1x32xf32>
    %5 = vector.shape_cast %4 : vector<1x32xf32> to vector<1x1x32xf32>
    %6 = vector.broadcast %5 : vector<1x1x32xf32> to vector<8x8x32xf32>
    %7 = arith.mulf %3, %6 : vector<8x8x32xf32>
    %cst = arith.constant dense<0.000000e+00> : vector<8x8xf32>
    %8 = vector.multi_reduction <add>, %7, %cst [2] : vector<8x8x32xf32> to vector<8x8xf32>
    %c0_5 = arith.constant 0 : index
    %c0_6 = arith.constant 0 : index
    %9 = vector.load %arg5[%c0_5, %c0_6] : memref<8x1xf32, #tpu.memory_space<vmem>>, vector<8x1xf32>
    %cst_7 = arith.constant dense<0xFF800000> : vector<8xf32>
    %10 = vector.multi_reduction <maximumf>, %8, %cst_7 [1] : vector<8x8xf32> to vector<8xf32>
    %11 = vector.shape_cast %10 : vector<8xf32> to vector<8x1xf32>
    %12 = arith.maximumf %9, %11 : vector<8x1xf32>
    %13 = arith.subf %9, %12 : vector<8x1xf32>
    %14 = math.exp %13 : vector<8x1xf32>
    %15 = vector.broadcast %12 : vector<8x1xf32> to vector<8x8xf32>
    %16 = arith.subf %8, %15 : vector<8x8xf32>
    %17 = math.exp %16 : vector<8x8xf32>
    %c0_8 = arith.constant 0 : index
    %c0_9 = arith.constant 0 : index
    %18 = vector.load %arg6[%c0_8, %c0_9] : memref<8x1xf32, #tpu.memory_space<vmem>>, vector<8x1xf32>
    %19 = arith.mulf %14, %18 : vector<8x1xf32>
    %cst_10 = arith.constant dense<0.000000e+00> : vector<8xf32>
    %20 = vector.multi_reduction <add>, %17, %cst_10 [1] : vector<8x8xf32> to vector<8xf32>
    %21 = vector.shape_cast %20 : vector<8xf32> to vector<8x1xf32>
    %22 = arith.addf %19, %21 : vector<8x1xf32>
    %c0_11 = arith.constant 0 : index
    %c0_12 = arith.constant 0 : index
    %23 = vector.load %arg6[%c0_11, %c0_12] : memref<8x1xf32, #tpu.memory_space<vmem>>, vector<8x1xf32>
    tpu.vector_store %arg6[%c0_11, %c0_12], %22 {strides = array<i32>} : memref<8x1xf32, #tpu.memory_space<vmem>>, vector<8x1xf32>,
    %c0_13 = arith.constant 0 : index
    %c0_14 = arith.constant 0 : index
    %24 = vector.load %arg7[%c0_13, %c0_14] : memref<8x32xf32, #tpu.memory_space<vmem>>, vector<8x32xf32>
    %25 = vector.broadcast %14 : vector<8x1xf32> to vector<8x32xf32>
    %26 = arith.mulf %25, %24 : vector<8x32xf32>
    %27 = vector.shape_cast %17 : vector<8x8xf32> to vector<8x8x1xf32>
    %28 = vector.broadcast %27 : vector<8x8x1xf32> to vector<8x8x32xf32>
    %29 = arith.mulf %3, %28 : vector<8x8x32xf32>
    %cst_15 = arith.constant dense<0.000000e+00> : vector<8x32xf32>
    %30 = vector.multi_reduction <add>, %29, %cst_15 [1] : vector<8x8x32xf32> to vector<8x32xf32>
    %31 = arith.addf %26, %30 : vector<8x32xf32>
    %c0_16 = arith.constant 0 : index
    %c0_17 = arith.constant 0 : index
    %32 = vector.load %arg7[%c0_16, %c0_17] : memref<8x32xf32, #tpu.memory_space<vmem>>, vector<8x32xf32>
    tpu.vector_store %arg7[%c0_16, %c0_17], %31 {strides = array<i32>} : memref<8x32xf32, #tpu.memory_space<vmem>>, vector<8x32xf32>,
    %c0_18 = arith.constant 0 : index
    %c0_19 = arith.constant 0 : index
    %33 = vector.load %arg5[%c0_18, %c0_19] : memref<8x1xf32, #tpu.memory_space<vmem>>, vector<8x1xf32>
    tpu.vector_store %arg5[%c0_18, %c0_19], %12 {strides = array<i32>} : memref<8x1xf32, #tpu.memory_space<vmem>>, vector<8x1xf32>,
    %c0_i32_20 = arith.constant 0 : i32
    %34 = arith.cmpi eq, %arg1, %c0_i32_20 : i32
    %35 = arith.extui %34 : i1 to i32
    %c0_i32_21 = arith.constant 0 : i32
    %36 = arith.cmpi ne, %35, %c0_i32_21 : i32
    scf.if %36 {
      %c0_22 = arith.constant 0 : index
      %c0_23 = arith.constant 0 : index
      %37 = vector.load %arg6[%c0_22, %c0_23] : memref<8x1xf32, #tpu.memory_space<vmem>>, vector<8x1xf32>
      %38 = tpu.reciprocal %37 : vector<8x1xf32> -> vector<8x1xf32>
      %c0_24 = arith.constant 0 : index
      %c0_25 = arith.constant 0 : index
      %39 = vector.load %arg7[%c0_24, %c0_25] : memref<8x32xf32, #tpu.memory_space<vmem>>, vector<8x32xf32>
      %40 = vector.broadcast %38 : vector<8x1xf32> to vector<8x32xf32>
      %41 = arith.mulf %39, %40 : vector<8x32xf32>
      %c0_26 = arith.constant 0 : index
      %c0_27 = arith.constant 0 : index
      %42 = vector.load %arg4[%c0_26, %c0_27] : memref<8x32xf32, #tpu.memory_space<vmem>>, vector<8x32xf32>
      tpu.vector_store %arg4[%c0_26, %c0_27], %41 {strides = array<i32>} : memref<8x32xf32, #tpu.memory_space<vmem>>, vector<8x32xf32>,
    } else {
    }
    return
  }
  func.func @transform_0(%arg0: i32, %arg1: i32) -> (i32, i32, i32) {
    %c0_i32 = arith.constant 0 : i32
    %c0_i32_0 = arith.constant 0 : i32
    return %arg0, %arg1, %c0_i32 : i32, i32, i32
  }
  func.func @transform_1(%arg0: i32, %arg1: i32) -> (i32, i32) {
    %c0_i32 = arith.constant 0 : i32
    %c0_i32_0 = arith.constant 0 : i32
    %c0_i32_1 = arith.constant 0 : i32
    return %c0_i32, %c0_i32_0 : i32, i32
  }
  func.func @transform_2(%arg0: i32, %arg1: i32) -> (i32, i32) {
    %c0_i32 = arith.constant 0 : i32
    %c0_i32_0 = arith.constant 0 : i32
    return %arg0, %c0_i32 : i32, i32
  }
}

</mosaic_0001>

<bundles_post_ra>
// kernel: tpu_custom_call.1
= control target key start
LH: loop header
LB: loop body
LE: loop exit
PB: predicated region body
PF: predicated region fallthrough
CT: control target
= control target key end

     0   :  { %7 = vsyncpa [#allocation6], 0  ;;  %s663_s0 = inlined_call_operand.hbm [shape: f32[8,8,32], index: 0, kind: input, shape index: {}]   ;;  %s664_s1 = inlined_call_operand.vmem [shape: f32[1,32], index: 1, kind: input, shape index: {}]   ;;  %s665_s2 = inlined_call_operand.hbm [shape: f32[8,32], index: 2, kind: output, shape index: {}]  }
   0x1   :  { %8 = vsyncpa [#allocation7], 0  ;;  %s497_s9 = smov [#allocation5]  }
   0x2   :  { %s14_s10 = sshll.u32 %s497_s9, 4  ;;  %s15_s10 = int_to_ptr.vmem [resolvable:$true] %s14_s10 }
   0x3   :  { %s461_s11 = scalar_lea.vmem %s15_s10, 1024  ;;  %p466_p1 = scmp.lt.s32.totalorder %s15_s10, %s15_s10 }
   0x4   :  { %p462_p0 = scmp.ne.s32.totalorder %s15_s10, %s461_s11  ;;  %p467_p2 = scmp.lt.s32.totalorder %s461_s11, %s461_s11 }
   0x6   :  { %p468_p3 = por %p467_p2, %p466_p1 }
   0x8   :  { %p469_p4 = pnand %p468_p3, %p462_p0 }
   0xa   :  { %472 = shalt.err (!%p469_p4)
}
   0xb   :  { %s498_s12 = smov 128   ;;  %s499_s13 = smov 8  }
   0xc   :  { %20 = dma.hbm_to_vmem [thread:$0]  %s663_s0, 1024, %s15_s10, [#allocation6], %s498_s12, %s498_s12, %s499_s13  }
   0xd   :  { %493 = dma.done.wait [#allocation6], 1024  }
   0xe   :  { %494 = vsyncadd [#allocation6], 4294966272  ;;  %vm33_vm0 = vcmask 261120   ;;  %v522_v0 = vld [vmem:[#allocation5] sm:$0xff]  ;;  %v423_v1 = vld [vmem:[%s664_s1] ss:$0 sm:$0xff]  ;;  %v92_v26 = vlaneseq }
   0xf   :  { %v527_v2 = vld [vmem:[#allocation5 + $0x10] sm:$0xff]  ;;  %v50_v3 = vmul.f32 %v423_v1, %v522_v0  ;;  %v531_v5 = vld [vmem:[#allocation5 + $0x8] sm:$0xff]  ;;  %v533_v6 = vld [vmem:[#allocation5 + $0x18] sm:$0xff]  ;;  %vm30_vm1 = vcmask 7168   ;;  %v500_v25 = vmov -inf   ;;  %vm126_vm2 = vcmask 1041409  }
  0x10   :  { %v52_v4 = vmul.f32 %v423_v1, %v527_v2  ;;  %v51_v7 = vmul.f32 %v423_v1, %v531_v5  ;;  %v53_v8 = vmul.f32 %v423_v1, %v533_v6  ;;  %v537_v9 = vld [vmem:[#allocation5 + $0x20] sm:$0xff]  ;;  %v539_v10 = vld [vmem:[#allocation5 + $0x28] sm:$0xff]  ;;  %v547_v17 = vld [vmem:[#allocation5 + $0x30] sm:$0xff]  ;;  %31 = vst.msk [vmem:[#allocation2] sm:$0xff] %vm30_vm1, %v500_v25  ;;  %v93_v27 = vand.u32 127, %v92_v26  ;;  %s503_s0 = smov [#allocation8]  }
  0x11   :  { %v59_v11 = vsel %vm33_vm0, %v50_v3, 0.0  ;;  %v54_v15 = vmul.f32 %v423_v1, %v537_v9  ;;  %v55_v16 = vmul.f32 %v423_v1, %v539_v10  ;;  %v549_v18 = vld [vmem:[#allocation5 + $0x38] sm:$0xff]  ;;  %v56_v21 = vmul.f32 %v423_v1, %v547_v17  ;;  %s414_s1 = sshll.u32 %s503_s0, 4  ;;  %s415_s1 = int_to_ptr.vmem [resolvable:$true] %s414_s1 }
  0x12   :  { %v65_v12 = vsel %vm33_vm0, %v52_v4, 0.0  ;;  %60 = vadd.xlane.f32.xlu0 %v59_v11  ;;  %v62_v13 = vsel %vm33_vm0, %v51_v7, 0.0  ;;  %v68_v14 = vsel %vm33_vm0, %v53_v8, 0.0  ;;  %v57_v22 = vmul.f32 %v423_v1, %v549_v18  ;;  %s473_s18 = scalar_lea.vmem %s415_s1, 128  ;;  %p478_p6 = scmp.lt.s32.totalorder %s415_s1, %s415_s1 }
  0x13   :  { %66 = vadd.xlane.f32.xlu1 %v65_v12  ;;  %v71_v19 = vsel %vm33_vm0, %v54_v15, 0.0  ;;  %v74_v20 = vsel %vm33_vm0, %v55_v16, 0.0  ;;  %v77_v23 = vsel %vm33_vm0, %v56_v21, 0.0  ;;  %v558_v28 = vshrl.u32 %v92_v26, 7  ;;  %p474_p5 = scmp.ne.s32.totalorder %s415_s1, %s473_s18  ;;  %p479_p7 = scmp.lt.s32.totalorder %s473_s18, %s473_s18 }
  0x14   :  { %v80_v24 = vsel %vm33_vm0, %v57_v22, 0.0  ;;  %vm128_vm3 = vcmask 1042434   ;;  %vm130_vm4 = vcmask 1043459   ;;  %vm132_vm5 = vcmask 1044484  }
  0x15   :  { %v563_v31 = vsub.s32 %v93_v27, %v558_v28  ;;  %vm134_vm6 = vcmask 1045509   ;;  %vm136_vm7 = vcmask 1046534   ;;  %vm138_vm8 = vcmask 1047559   ;;  %p480_p8 = por %p479_p7, %p478_p6 }
  0x16   :  { %63 = vadd.xlane.f32.xlu0 %v62_v13  ;;  %vm141_vm9 = vcmask 64512   ;;  %v501_v54 = vmov 0   ;;  %v502_v55 = vmov 0.0   ;;  %v155_v60 = vsub.s32 0, %v558_v28 }
  0x17   :  { %69 = vadd.xlane.f32.xlu1 %v68_v14  ;;  %432 = vset.pattern.permute.xlu0 %v501_v54  ;;  %34 = vst.msk [vmem:[#allocation4] sm:$0xff] %vm33_vm0, %v502_v55  ;;  %v83_v56 = vld [vmem:[#allocation2] sm:$0xff]  ;;  %v159_v61 = vsub.s32 1, %v558_v28  ;;  %v163_v62 = vsub.s32 2, %v558_v28  ;;  %v167_v63 = vsub.s32 3, %v558_v28  ;;  %v171_v12 = vsub.s32 4, %v558_v28  ;;  %p481_p9 = pnand %p480_p8, %p474_p5 }
  0x18   :  { %431 = vset.pattern.permute.xlu1 %v501_v54  ;;  %32 = vst.msk [vmem:[#allocation3] sm:$0xff] %vm30_vm1, %v502_v55 }
  0x1a   :  { %72 = vadd.xlane.f32.xlu0 %v71_v19 }
  0x1b   :  { %75 = vadd.xlane.f32.xlu1 %v74_v20  ;;  %v175_v20 = vsub.s32 5, %v558_v28 }
  0x1e   :  { %78 = vadd.xlane.f32.xlu0 %v77_v23 }
  0x1f   :  { %81 = vadd.xlane.f32.xlu1 %v80_v24  ;;  %v179_v24 = vsub.s32 6, %v558_v28 }
  0x9b   :  { %v61_v29 = vpop.xlane.xlu0 %60 }
  0x9c   :  { %v560_v30 = vpop.xlane.xlu1 %66  ;;  %v97_v34 = vrot.slane %v61_v29, %v563_v31 }
  0x9d   :  { %v105_v37 = vrot.slane %v560_v30, %v563_v31 }
  0x9f   :  { %v64_v32 = vpop.xlane.xlu0 %63 }
  0xa0   :  { %v565_v33 = vpop.xlane.xlu1 %69  ;;  %v101_v35 = vrot.slane %v64_v32, %v563_v31 }
  0xa1   :  { %v109_v36 = vrot.slane %v565_v33, %v563_v31 }
  0xa2   :  { %v127_v38 = vsel %vm126_vm2, %v101_v35, %v97_v34 }
  0xa3   :  { %v129_v39 = vsel %vm128_vm3, %v105_v37, %v127_v38  ;;  %v575_v40 = vpop.xlane.xlu0 %72 }
  0xa4   :  { %v577_v41 = vpop.xlane.xlu1 %75  ;;  %v131_v42 = vsel %vm130_vm4, %v109_v36, %v129_v39  ;;  %v113_v43 = vrot.slane %v575_v40, %v563_v31 }
  0xa5   :  { %v117_v44 = vrot.slane %v577_v41, %v563_v31 }
  0xa6   :  { %v133_v45 = vsel %vm132_vm5, %v113_v43, %v131_v42 }
  0xa7   :  { %v585_v46 = vpop.xlane.xlu0 %78  ;;  %v135_v50 = vsel %vm134_vm6, %v117_v44, %v133_v45 }
  0xa8   :  { %v587_v47 = vpop.xlane.xlu1 %81  ;;  %v121_v48 = vrot.slane %v585_v46, %v563_v31 }
  0xa9   :  { %v125_v49 = vrot.slane %v587_v47, %v563_v31 }
  0xaa   :  { %v137_v51 = vsel %vm136_vm7, %v121_v48, %v135_v50 }
  0xab   :  { %v139_v52 = vsel %vm138_vm8, %v125_v49, %v137_v51 }
  0xac   :  { %v142_v53 = vsel %vm141_vm9, %v139_v52, -inf }
  0xad   :  { %143 = vmax.xlane.f32.xlu0 %v142_v53 }
 0x136   :  { %v144_v57 = vpop.xlane.xlu0 %143 }
 0x137   :  { %v145_v58 = vmax.f32 %v83_v56, %v144_v57 }
 0x139   :  { %v146_v59 = vsub.f32 %v83_v56, %v145_v58  ;;  %394 = vst.msk [vmem:[#allocation2] sm:$0xff] %vm30_vm1, %v145_v58  ;;  %151 = vperm.xlu1 %431, %v145_v58  }
 0x13b   :  { %v147_v19 = vmul.f32 1.442695, %v146_v59 }
 0x1b4   :  { %v152_v1 = vpop.permute.xlu1 %151 }
 0x1b5   :  { %v156_v3 = vrot.slane %v152_v1, %v155_v60  ;;  %v160_v4 = vrot.slane %v152_v1, %v159_v61  ;;  %v164_v7 = vrot.slane %v152_v1, %v163_v62  ;;  %v168_v13 = vrot.slane %v152_v1, %v167_v63 }
 0x1b6   :  { %v172_v21 = vrot.slane %v152_v1, %v171_v12  ;;  %v176_v25 = vrot.slane %v152_v1, %v175_v20 }
 0x1b7   :  { %v193_v8 = vsub.f32 %v61_v29, %v156_v3  ;;  %v194_v11 = vsub.f32 %v64_v32, %v160_v4  ;;  %v195_v14 = vsub.f32 %v560_v30, %v164_v7  ;;  %v196_v22 = vsub.f32 %v565_v33, %v168_v13 }
 0x1b8   :  { %v197_v26 = vsub.f32 %v575_v40, %v172_v21  ;;  %v183_v29 = vsub.s32 7, %v558_v28  ;;  %v180_v30 = vrot.slane %v152_v1, %v179_v24  ;;  %v198_v32 = vsub.f32 %v577_v41, %v176_v25 }
 0x1b9   :  { %v201_v15 = vmul.f32 1.442695, %v193_v8  ;;  %v203_v16 = vmul.f32 1.442695, %v194_v11  ;;  %v205_v23 = vmul.f32 1.442695, %v195_v14 }
 0x1ba   :  { %v207_v27 = vmul.f32 1.442695, %v196_v22  ;;  %v209_v34 = vmul.f32 1.442695, %v197_v26  ;;  %v184_v36 = vrot.slane %v152_v1, %v183_v29  ;;  %v199_v33 = vsub.f32 %v585_v46, %v180_v30 }
 0x1bb   :  { %433 = vpow2.f32 %v201_v15  ;;  %v211_v37 = vmul.f32 1.442695, %v198_v32 }
 0x1bc   :  { %435 = vpow2.f32 %v203_v16  ;;  %v200_v40 = vsub.f32 %v587_v47, %v184_v36  ;;  %v213_v28 = vmul.f32 1.442695, %v199_v33 }
 0x1bd   :  { %437 = vpow2.f32 %v147_v19 }
 0x1be   :  { %439 = vpow2.f32 %v205_v23  ;;  %v215_v41 = vmul.f32 1.442695, %v200_v40 }
 0x1bf   :  { %441 = vpow2.f32 %v207_v27 }
 0x1c0   :  { %443 = vpow2.f32 %v209_v34 }
 0x1c1   :  { %445 = vpow2.f32 %v211_v37 }
 0x1c2   :  { %447 = vpow2.f32 %v213_v28 }
 0x1c3   :  { %449 = vpow2.f32 %v215_v41 }
 0x1c8   :  { %v434_v35 = vpop.eup %433 }
 0x1c9   :  { %v436_v38 = vpop.eup %435  ;;  %228 = vperm.xlu0 %432, %v434_v35  }
 0x1ca   :  { %231 = vperm.xlu1 %431, %v436_v38   ;;  %v613_v39 = vpop.eup %437 }
 0x1cb   :  { %v440_v42 = vpop.eup %439 }
 0x1cc   :  { %v442_v43 = vpop.eup %441 }
 0x1cd   :  { %300 = vperm.xlu0 %432, %v613_v39   ;;  %v444_v44 = vpop.eup %443 }
 0x1ce   :  { %234 = vperm.xlu1 %431, %v440_v42   ;;  %v446_v45 = vpop.eup %445 }
 0x1cf   :  { %v448_v46 = vpop.eup %447 }
 0x1d0   :  { %v450_v48 = vpop.eup %449 }
 0x1d2   :  { %237 = vperm.xlu1 %431, %v442_v43  }
 0x1d6   :  { %240 = vperm.xlu1 %431, %v444_v44  }
 0x1da   :  { %243 = vperm.xlu1 %431, %v446_v45  }
 0x1de   :  { %246 = vperm.xlu1 %431, %v448_v46  }
 0x1e2   :  { %249 = vperm.xlu1 %431, %v450_v48  }
 0x244   :  { %v229_v47 = vpop.permute.xlu0 %228 }
 0x245   :  { %v232_v49 = vpop.permute.xlu1 %231  ;;  %v312_v50 = vmul.f32 %v229_v47, %v522_v0 }
 0x246   :  { %v313_v51 = vmul.f32 %v232_v49, %v531_v5  ;;  %v258_v13 = vrot.slane %v232_v49, %v563_v31 }
 0x247   :  { %v320_v52 = vsel %vm33_vm0, %v312_v50, 0.0 }
 0x248   :  { %v327_v55 = vsel %vm33_vm0, %v313_v51, 0.0  ;;  %v321_v56 = vrot.slane %v320_v52, 4 }
 0x249   :  { %v235_v53 = vpop.permute.xlu1 %234  ;;  %v328_v60 = vrot.slane %v327_v55, 4 }
 0x24a   :  { %v314_v54 = vmul.f32 %v235_v53, %v527_v2  ;;  %v322_v61 = vadd.f32 %v321_v56, %v320_v52  ;;  %v262_v16 = vrot.slane %v235_v53, %v563_v31 }
 0x24b   :  { %v329_v3 = vadd.f32 %v328_v60, %v327_v55 }
 0x24c   :  { %v334_v57 = vsel %vm33_vm0, %v314_v54, 0.0  ;;  %v323_v4 = vrot.slane %v322_v61, 2 }
 0x24d   :  { %v238_v58 = vpop.permute.xlu1 %237  ;;  %v335_v62 = vrot.slane %v334_v57, 4  ;;  %v330_v15 = vrot.slane %v329_v3, 2 }
 0x24e   :  { %v315_v59 = vmul.f32 %v238_v58, %v533_v6  ;;  %v254_v6 = vrot.slane %v229_v47, %v563_v31  ;;  %v324_v20 = vadd.f32 %v323_v4, %v322_v61  ;;  %v266_v21 = vrot.slane %v238_v58, %v563_v31 }
 0x24f   :  { %v336_v2 = vadd.f32 %v335_v62, %v334_v57  ;;  %v331_v32 = vadd.f32 %v330_v15, %v329_v3 }
 0x250   :  { %v341_v0 = vsel %vm33_vm0, %v315_v59, 0.0  ;;  %v283_v27 = vsel %vm126_vm2, %v258_v13, %v254_v6  ;;  %v325_v33 = vrot.slane %v324_v20, 1  ;;  %v301_v13 = vpop.permute.xlu0 %300 }
 0x251   :  { %v342_v63 = vrot.slane %v341_v0, 4  ;;  %v241_v5 = vpop.permute.xlu1 %240  ;;  %v284_v34 = vsel %vm128_vm3, %v262_v16, %v283_v27  ;;  %v332_v47 = vrot.slane %v331_v32, 1 }
 0x252   :  { %v316_v1 = vmul.f32 %v241_v5, %v537_v9  ;;  %v337_v9 = vrot.slane %v336_v2, 2  ;;  %v270_v24 = vrot.slane %v241_v5, %v563_v31  ;;  %v285_v38 = vsel %vm130_vm4, %v266_v21, %v284_v34 }
 0x253   :  { %v343_v8 = vadd.f32 %v342_v63, %v341_v0  ;;  %v326_v58 = vadd.f32 %v325_v33, %v324_v20 }
 0x254   :  { %v348_v7 = vsel %vm33_vm0, %v316_v1, 0.0  ;;  %v338_v37 = vadd.f32 %v337_v9, %v336_v2  ;;  %v286_v42 = vsel %vm132_vm5, %v270_v24, %v285_v38 }
 0x255   :  { %v349_v11 = vrot.slane %v348_v7, 4  ;;  %v244_v12 = vpop.permute.xlu1 %243  ;;  %v344_v23 = vrot.slane %v343_v8, 2 }
 0x256   :  { %v317_v14 = vmul.f32 %v244_v12, %v539_v10  ;;  %v274_v10 = vrot.slane %v244_v12, %v563_v31  ;;  %v339_v52 = vrot.slane %v338_v37, 1  ;;  %v297_v12 = vld [vmem:[#allocation4] sm:$0xff] }
 0x257   :  { %v350_v19 = vadd.f32 %v349_v11, %v348_v7  ;;  %v345_v28 = vadd.f32 %v344_v23, %v343_v8  ;;  %v303_v20 = vmul.f32 %v301_v13, %v297_v12  ;;  %v217_v23 = vld [vmem:[#allocation3] sm:$0xff] }
 0x258   :  { %v355_v22 = vsel %vm33_vm0, %v317_v14, 0.0  ;;  %v287_v48 = vsel %vm134_vm6, %v274_v10, %v286_v42  ;;  %v340_v0 = vadd.f32 %v339_v52, %v338_v37  ;;  %v218_v24 = vmul.f32 %v613_v39, %v217_v23 }
 0x259   :  { %v356_v25 = vrot.slane %v355_v22, 4  ;;  %v247_v26 = vpop.permute.xlu1 %246  ;;  %v351_v29 = vrot.slane %v350_v19, 2  ;;  %v346_v55 = vrot.slane %v345_v28, 1 }
 0x25a   :  { %v318_v30 = vmul.f32 %v247_v26, %v547_v17  ;;  %v278_v36 = vrot.slane %v247_v26, %v563_v31 }
 0x25b   :  { %v357_v35 = vadd.f32 %v356_v25, %v355_v22  ;;  %v352_v45 = vadd.f32 %v351_v29, %v350_v19  ;;  %v347_v63 = vadd.f32 %v346_v55, %v345_v28 }
 0x25c   :  { %v362_v40 = vsel %vm33_vm0, %v318_v30, 0.0  ;;  %v288_v51 = vsel %vm136_vm7, %v278_v36, %v287_v48 }
 0x25d   :  { %v358_v41 = vrot.slane %v357_v35, 2  ;;  %v363_v43 = vrot.slane %v362_v40, 4  ;;  %v250_v44 = vpop.permute.xlu1 %249  ;;  %v353_v59 = vrot.slane %v352_v45, 1 }
 0x25e   :  { %v282_v17 = vrot.slane %v250_v44, %v563_v31  ;;  %v319_v46 = vmul.f32 %v250_v44, %v549_v18  ;;  %v333_v18 = vadd.f32 %v332_v47, %v331_v32 }
 0x25f   :  { %v359_v49 = vadd.f32 %v358_v41, %v357_v35  ;;  %v364_v50 = vadd.f32 %v363_v43, %v362_v40  ;;  %v354_v3 = vadd.f32 %v353_v59, %v352_v45 }
 0x260   :  { %v369_v53 = vsel %vm33_vm0, %v319_v46, 0.0  ;;  %v289_v54 = vsel %vm138_vm8, %v282_v17, %v288_v51  ;;  %v384_v4 = vsel %vm126_vm2, %v333_v18, %v326_v58 }
 0x261   :  { %v365_v56 = vrot.slane %v364_v50, 2  ;;  %v370_v57 = vrot.slane %v369_v53, 4  ;;  %v291_v31 = vsel %vm141_vm9, %v289_v54, 0.0  ;;  %v360_v60 = vrot.slane %v359_v49, 1 }
 0x262   :  { %292 = vadd.xlane.f32.xlu1 %v291_v31  ;;  %v385_v8 = vsel %vm128_vm3, %v340_v0, %v384_v4 }
 0x263   :  { %v366_v61 = vadd.f32 %v365_v56, %v364_v50  ;;  %v371_v62 = vadd.f32 %v370_v57, %v369_v53  ;;  %v361_v2 = vadd.f32 %v360_v60, %v359_v49  ;;  %v386_v6 = vsel %vm130_vm4, %v347_v63, %v385_v8 }
 0x264   :  { %v387_v15 = vsel %vm132_vm5, %v354_v3, %v386_v6 }
 0x265   :  { %v367_v5 = vrot.slane %v366_v61, 1  ;;  %v372_v1 = vrot.slane %v371_v62, 2  ;;  %v388_v16 = vsel %vm134_vm6, %v361_v2, %v387_v15 }
 0x267   :  { %v373_v7 = vadd.f32 %v372_v1, %v371_v62  ;;  %v368_v11 = vadd.f32 %v367_v5, %v366_v61 }
 0x269   :  { %v374_v14 = vrot.slane %v373_v7, 1  ;;  %v389_v9 = vsel %vm136_vm7, %v368_v11, %v388_v16 }
 0x26b   :  { %v375_v19 = vadd.f32 %v374_v14, %v373_v7 }
 0x26d   :  { %v390_v21 = vsel %vm138_vm8, %v375_v19, %v389_v9 }
 0x26e   :  { %v392_v22 = vadd.f32 %v390_v21, %v303_v20 }
 0x270   :  { %393 = vst.msk [vmem:[#allocation4] sm:$0xff] %vm33_vm0, %v392_v22 }
 0x277   :  { %v400_v10 = vld [vmem:[#allocation4] sm:$0xff] }
 0x2eb   :  { %v293_v25 = vpop.xlane.xlu1 %292 }
 0x2ec   :  { %v294_v26 = vadd.f32 %v293_v25, %v218_v24 }
 0x2ee   :  { %296 = vst.msk [vmem:[#allocation3] sm:$0xff] %vm30_vm1, %v294_v26 }
 0x2f5   :  { %v398_v27 = vld [vmem:[#allocation3] sm:$0xff] }
 0x2f6   :  { %451 = vrcp.f32 %v398_v27 }
 0x303   :  { %v452_v29 = vpop.eup %451 }
 0x304   :  { %403 = vperm.xlu0 %432, %v452_v29  }
 0x37f   :  { %v404_v30 = vpop.permute.xlu0 %403 }
 0x380   :  { %v406_v32 = vmul.f32 %v404_v30, %v400_v10 }
 0x382   :  { %407 = vst.msk [vmem:[#allocation8] sm:$0xff] %vm33_vm0, %v406_v32 }
 0x383   :  { %484 = shalt.err (!%p481_p9)
}
 0x384   :  { %417 = dma.vmem_to_hbm [thread:$0]  %s415_s1, 128, %s665_s2, [#allocation7]  }
 0x385   :  { %495 = dma.done.wait [#allocation7], 128  }
 0x386   :  { %496 = vsyncadd [#allocation7], 4294967168 }
 0x387   :  { %421 = vsyncpa [#allocation6], 1 }
 0x388   :  { %422 = vsyncpa [#allocation7], 1 }

</bundles_post_ra>
